<compile_context>
chip_gen: v7x
topology: tpu7x:2x2x1
jax: 0.10.0
libtpu: 0.0.40
codegen_flags: <defaults>
</compile_context>

<pallas_src>
import functools

import jax
import jax.numpy as jnp
from jax.experimental import pallas as pl
from jax.experimental.pallas import tpu as pltpu


HIDDEN = 64          # per-network hidden width (PyTorch spec)
HP = 2 * HIDDEN      # fused (actor|critic) hidden width = 128 lanes
OUT_W = 128          # lane-dense packed output width
TB_MAX = 2048        # max batch rows per grid step (VMEM use stays a few MiB)


def _round_up(n, m):
    return ((n + m - 1) // m) * m


def _cdiv(a, b):
    return (a + b - 1) // b


def _default_bf16_tanh():
    # v6e / v7x have a bf16 EUP (~2x transcendental throughput); v5e does not,
    # so bf16 tanh would silently upcast and gain nothing there.
    try:
        kind = jax.devices()[0].device_kind.lower()
    except Exception:
        return True
    return "v5" not in kind


def ppo_fused_kernel(x_ref, w1_ref, b1_ref, w2_ref, b2_ref, w3_ref, b3_ref,
                     smax_bias_ref, vsel_ref, out_ref, *, bf16_tanh):
    # x: bf16 [TB, S]; weights bf16; biases / masks f32; accumulation f32.
    x = x_ref[...]

    def act(pre):
        # tanh on the EUP; bf16 on v6e/v7x (feeds the bf16 MXU directly),
        # f32 on v5e with a single cast to bf16 for the next matmul.
        if bf16_tanh:
            return jnp.tanh(pre.astype(jnp.bfloat16))
        return jnp.tanh(pre).astype(jnp.bfloat16)

    h = act(jnp.dot(x, w1_ref[...], preferred_element_type=jnp.float32) + b1_ref[...])
    h = act(jnp.dot(h, w2_ref[...], preferred_element_type=jnp.float32) + b2_ref[...])
    z = jnp.dot(h, w3_ref[...], preferred_element_type=jnp.float32) + b3_ref[...]
    # z: [TB, 128] — lanes [0:A) actor logits, lane A critic value, rest exact 0.

    # Numerically-stable softmax over the actor lanes only.  The mask is a
    # resident [1,128] additive bias (0 actor lanes, -1e30 elsewhere) — no
    # per-step full-tile iota/compare/select.
    logits = z + smax_bias_ref[...]
    m = jnp.max(logits, axis=-1, keepdims=True)
    e = jnp.exp(logits - m)                       # masked lanes underflow to exact 0
    denom = jnp.sum(e, axis=-1, keepdims=True)
    probs = e / denom                             # exact reciprocal: denom is [TB,1]

    # Packed lane-dense output: probs on actor lanes, critic value on lane A
    # (probs is exactly 0 there), exact zeros above.  Stored bf16 to halve the
    # dominant HBM writeback stream.
    out_ref[...] = (probs + z * vsel_ref[...]).astype(out_ref.dtype)


def _ppo_forward_pallas(x, params):
    B, state_dim = x.shape
    action_dim = params["aw3"].shape[1]
    assert action_dim + 1 <= OUT_W

    # ---- pack actor + critic into lane-dense fused weights (wrapper side) ----
    w1 = jnp.concatenate([params["aw1"], params["cw1"]], axis=1)          # [S, 128]
    b1 = jnp.concatenate([params["ab1"], params["cb1"]], axis=1)          # [1, 128]

    w2 = jnp.zeros((HP, HP), jnp.float32)                                 # block-diagonal
    w2 = w2.at[:HIDDEN, :HIDDEN].set(params["aw2"])
    w2 = w2.at[HIDDEN:, HIDDEN:].set(params["cw2"])
    b2 = jnp.concatenate([params["ab2"], params["cb2"]], axis=1)          # [1, 128]

    w3 = jnp.zeros((HP, OUT_W), jnp.float32)                              # block-diagonal, padded
    w3 = w3.at[:HIDDEN, :action_dim].set(params["aw3"])
    w3 = w3.at[HIDDEN:, action_dim:action_dim + 1].set(params["cw3"])
    b3 = jnp.zeros((1, OUT_W), jnp.float32)
    b3 = b3.at[:, :action_dim].set(params["ab3"])
    b3 = b3.at[:, action_dim:action_dim + 1].set(params["cb3"])

    # bf16 MXU inputs; biases stay f32.
    w1 = w1.astype(jnp.bfloat16)
    w2 = w2.astype(jnp.bfloat16)
    w3 = w3.astype(jnp.bfloat16)

    # Hoisted softmax mask (additive bias) and value-lane selector, resident.
    lane_ids = jnp.arange(OUT_W)
    smax_bias = jnp.where(lane_ids < action_dim, 0.0, -1e30)
    smax_bias = smax_bias.astype(jnp.float32).reshape(1, OUT_W)
    vsel = (lane_ids == action_dim).astype(jnp.float32).reshape(1, OUT_W)

    # ---- batch tiling ----
    # Big blocks amortize the ~0.35 us per-grid-step overhead; padding is
    # bounded by ~16 rows per block (not a full TB).  Keep >= 2 grid steps for
    # moderate batches so ("parallel",) can split across v7x's two TensorCores.
    n_blocks = max(_cdiv(B, TB_MAX), 1)
    if n_blocks == 1 and B >= 64:
        n_blocks = 2
    TB = _round_up(_cdiv(B, n_blocks), 16)        # multiple of 16: bf16 sublane packing
    Bp = _round_up(B, TB)
    grid = (Bp // TB,)

    xb = x.astype(jnp.bfloat16)
    if Bp != B:
        xb = jnp.pad(xb, ((0, Bp - B), (0, 0)))

    const = lambda i: (0, 0)   # weight / bias / mask blocks: resident across steps

    bf16_tanh = _default_bf16_tanh()

    out_packed = pl.pallas_call(
        functools.partial(ppo_fused_kernel, bf16_tanh=bf16_tanh),
        out_shape=jax.ShapeDtypeStruct((Bp, OUT_W), jnp.bfloat16),
        grid=grid,
        in_specs=[
            pl.BlockSpec((TB, state_dim), lambda i: (i, 0)),   # x: pipelined over batch
            pl.BlockSpec((state_dim, HP), const),              # W1
            pl.BlockSpec((1, HP), const),                      # b1
            pl.BlockSpec((HP, HP), const),                     # W2
            pl.BlockSpec((1, HP), const),                      # b2
            pl.BlockSpec((HP, OUT_W), const),                  # W3
            pl.BlockSpec((1, OUT_W), const),                   # b3
            pl.BlockSpec((1, OUT_W), const),                   # softmax mask bias
            pl.BlockSpec((1, OUT_W), const),                   # value-lane selector
        ],
        out_specs=pl.BlockSpec((TB, OUT_W), lambda i: (i, 0)),
        compiler_params=pltpu.CompilerParams(
            dimension_semantics=("parallel",),                 # shard batch over TCs (v7x)
        ),
    )(xb, w1, b1, w2, b2, w3, b3, smax_bias, vsel)

    # Slice the bf16 slab (half the traffic of the old f32 slab); only the tiny
    # probs / value slices are upcast.  Downstream code that can consume the
    # packed [B, 128] bf16 slab directly should do so to avoid the slice reads.
    probs = out_packed[:B, :action_dim].astype(jnp.float32)
    value = out_packed[:B, action_dim:action_dim + 1].astype(jnp.float32)
    return probs, value


def ppo_forward(x, params, *, use_pallas=None):
    """x: [B, state_dim] float32. Returns (probs [B, action_dim], value [B, 1])."""
    B = x.shape[0]
    if use_pallas is None:
        # Tiny batches: kernel launch + single-grid-step overhead dominates;
        # XLA's fused GEMM path wins there.
        use_pallas = B > 256
    if not use_pallas:
        return ppo_forward_ref(x, params)
    return _ppo_forward_pallas(x, params)


def init_params(key, state_dim, action_dim, hidden=HIDDEN):
    """Deterministic init matching the nn.Linear shapes (stored as [in, out])."""
    def linear(key, fan_in, fan_out):
        kw, kb = jax.random.split(key)
        bound = 1.0 / jnp.sqrt(jnp.float32(fan_in))
        w = jax.random.uniform(kw, (fan_in, fan_out), jnp.float32, -bound, bound)
        b = jax.random.uniform(kb, (1, fan_out), jnp.float32, -bound, bound)
        return w, b

    keys = jax.random.split(key, 6)
    aw1, ab1 = linear(keys[0], state_dim, hidden)
    aw2, ab2 = linear(keys[1], hidden, hidden)
    aw3, ab3 = linear(keys[2], hidden, action_dim)
    cw1, cb1 = linear(keys[3], state_dim, hidden)
    cw2, cb2 = linear(keys[4], hidden, hidden)
    cw3, cb3 = linear(keys[5], hidden, 1)
    return dict(
        aw1=aw1, ab1=ab1, aw2=aw2, ab2=ab2, aw3=aw3, ab3=ab3,
        cw1=cw1, cb1=cb1, cw2=cw2, cb2=cb2, cw3=cw3, cb3=cb3,
    )


def ppo_forward_ref(x, p):
    """Pure-JAX f32 reference (also the small-batch XLA path)."""
    h = jnp.tanh(x @ p["aw1"] + p["ab1"])
    h = jnp.tanh(h @ p["aw2"] + p["ab2"])
    logits = h @ p["aw3"] + p["ab3"]
    probs = jax.nn.softmax(logits, axis=-1)
    c = jnp.tanh(x @ p["cw1"] + p["cb1"])
    c = jnp.tanh(c @ p["cw2"] + p["cb2"])
    value = c @ p["cw3"] + p["cb3"]
    return probs, value


if __name__ == "__main__":
    key = jax.random.PRNGKey(0)
    k_x, k_p = jax.random.split(key)

    B, state_dim, action_dim = 4, 32, 8
    x = jax.random.normal(k_x, (B, state_dim), jnp.float32)
    params = init_params(k_p, state_dim, action_dim)

    # Force the Pallas path even at this tiny test batch (auto-dispatch routes
    # B <= 256 to the plain XLA path).
    probs, value = ppo_forward(x, params, use_pallas=True)
    probs = jax.block_until_ready(probs)
    value = jax.block_until_ready(value)

    probs_ref, value_ref = ppo_forward_ref(x, params)
    assert probs.shape == (B, action_dim) and value.shape == (B, 1)
    # bf16 MXU inputs + bf16 packed output => ~1e-2 level agreement vs f32 ref.
    assert jnp.allclose(probs, probs_ref, atol=3e-2, rtol=3e-2), (probs, probs_ref)
    assert jnp.allclose(value, value_ref, atol=5e-2, rtol=5e-2), (value, value_ref)
    assert jnp.allclose(jnp.sum(probs, axis=-1), 1.0, atol=1e-2)

    # Auto-dispatch small-batch path (plain XLA) must match the reference exactly.
    probs_xla, value_xla = ppo_forward(x, params)
    assert jnp.allclose(probs_xla, probs_ref) and jnp.allclose(value_xla, value_ref)

    # TODO(synk): Categorical sampling in select_action (when action is None) is
    # left to host-side jax.random.categorical on the returned probs; the kernel
    # implements the deterministic actor/critic compute path.
    print("KERNEL_OK")
</pallas_src>

<mosaic_0001>
module attributes {stable_mosaic.version = 11 : i64} {
  func.func @ppo_fused_kernel(%arg0: i32, %arg1: memref<16x32xbf16, #tpu.memory_space<vmem>>, %arg2: memref<32x128xbf16, #tpu.memory_space<vmem>>, %arg3: memref<1x128xf32, #tpu.memory_space<vmem>>, %arg4: memref<128x128xbf16, #tpu.memory_space<vmem>>, %arg5: memref<1x128xf32, #tpu.memory_space<vmem>>, %arg6: memref<128x128xbf16, #tpu.memory_space<vmem>>, %arg7: memref<1x128xf32, #tpu.memory_space<vmem>>, %arg8: memref<1x128xf32, #tpu.memory_space<vmem>>, %arg9: memref<1x128xf32, #tpu.memory_space<vmem>>, %arg10: memref<16x128xbf16, #tpu.memory_space<vmem>>) attributes {dimension_semantics = [#tpu.dimension_semantics<parallel>], iteration_bounds = array<i64: 1>, scalar_prefetch = 0 : i64, scratch_operands = 0 : i64, tpu.core_type = #tpu.core_type<tc>, window_params = [{transform_indices = @transform_0, window_bounds = array<i64: 16, 32>}, {pipeline_mode = #tpu.pipeline_mode<synchronous>, transform_indices = @transform_1, window_bounds = array<i64: 32, 128>}, {pipeline_mode = #tpu.pipeline_mode<synchronous>, transform_indices = @transform_2, window_bounds = array<i64: 1, 128>}, {pipeline_mode = #tpu.pipeline_mode<synchronous>, transform_indices = @transform_3, window_bounds = array<i64: 128, 128>}, {pipeline_mode = #tpu.pipeline_mode<synchronous>, transform_indices = @transform_4, window_bounds = array<i64: 1, 128>}, {pipeline_mode = #tpu.pipeline_mode<synchronous>, transform_indices = @transform_5, window_bounds = array<i64: 128, 128>}, {pipeline_mode = #tpu.pipeline_mode<synchronous>, transform_indices = @transform_6, window_bounds = array<i64: 1, 128>}, {pipeline_mode = #tpu.pipeline_mode<synchronous>, transform_indices = @transform_7, window_bounds = array<i64: 1, 128>}, {pipeline_mode = #tpu.pipeline_mode<synchronous>, transform_indices = @transform_8, window_bounds = array<i64: 1, 128>}, {transform_indices = @transform_9, window_bounds = array<i64: 16, 128>}]} {
    %c0 = arith.constant 0 : index
    %c0_0 = arith.constant 0 : index
    %0 = vector.load %arg1[%c0, %c0_0] : memref<16x32xbf16, #tpu.memory_space<vmem>>, vector<16x32xbf16>
    %c0_1 = arith.constant 0 : index
    %c0_2 = arith.constant 0 : index
    %1 = vector.load %arg2[%c0_1, %c0_2] : memref<32x128xbf16, #tpu.memory_space<vmem>>, vector<32x128xbf16>
    %cst = arith.constant dense<0.000000e+00> : vector<16x128xf32>
    %2 = tpu.matmul %0, %1, %cst {dimension_numbers = #tpu.dot_dimension_numbers<[1], [0], [0], [1], [0, 0, 1, 1], [], []>} : vector<16x32xbf16>, vector<32x128xbf16>, vector<16x128xf32> -> vector<16x128xf32>
    %c0_3 = arith.constant 0 : index
    %c0_4 = arith.constant 0 : index
    %3 = vector.load %arg3[%c0_3, %c0_4] : memref<1x128xf32, #tpu.memory_space<vmem>>, vector<1x128xf32>
    %4 = vector.broadcast %3 : vector<1x128xf32> to vector<16x128xf32>
    %5 = arith.addf %2, %4 : vector<16x128xf32>
    %6 = arith.truncf %5 : vector<16x128xf32> to vector<16x128xbf16>
    %7 = math.tanh %6 : vector<16x128xbf16>
    %c0_5 = arith.constant 0 : index
    %c0_6 = arith.constant 0 : index
    %8 = vector.load %arg4[%c0_5, %c0_6] : memref<128x128xbf16, #tpu.memory_space<vmem>>, vector<128x128xbf16>
    %cst_7 = arith.constant dense<0.000000e+00> : vector<16x128xf32>
    %9 = tpu.matmul %7, %8, %cst_7 {dimension_numbers = #tpu.dot_dimension_numbers<[1], [0], [0], [1], [0, 0, 1, 1], [], []>} : vector<16x128xbf16>, vector<128x128xbf16>, vector<16x128xf32> -> vector<16x128xf32>
    %c0_8 = arith.constant 0 : index
    %c0_9 = arith.constant 0 : index
    %10 = vector.load %arg5[%c0_8, %c0_9] : memref<1x128xf32, #tpu.memory_space<vmem>>, vector<1x128xf32>
    %11 = vector.broadcast %10 : vector<1x128xf32> to vector<16x128xf32>
    %12 = arith.addf %9, %11 : vector<16x128xf32>
    %13 = arith.truncf %12 : vector<16x128xf32> to vector<16x128xbf16>
    %14 = math.tanh %13 : vector<16x128xbf16>
    %c0_10 = arith.constant 0 : index
    %c0_11 = arith.constant 0 : index
    %15 = vector.load %arg6[%c0_10, %c0_11] : memref<128x128xbf16, #tpu.memory_space<vmem>>, vector<128x128xbf16>
    %cst_12 = arith.constant dense<0.000000e+00> : vector<16x128xf32>
    %16 = tpu.matmul %14, %15, %cst_12 {dimension_numbers = #tpu.dot_dimension_numbers<[1], [0], [0], [1], [0, 0, 1, 1], [], []>} : vector<16x128xbf16>, vector<128x128xbf16>, vector<16x128xf32> -> vector<16x128xf32>
    %c0_13 = arith.constant 0 : index
    %c0_14 = arith.constant 0 : index
    %17 = vector.load %arg7[%c0_13, %c0_14] : memref<1x128xf32, #tpu.memory_space<vmem>>, vector<1x128xf32>
    %18 = vector.broadcast %17 : vector<1x128xf32> to vector<16x128xf32>
    %19 = arith.addf %16, %18 : vector<16x128xf32>
    %c0_15 = arith.constant 0 : index
    %c0_16 = arith.constant 0 : index
    %20 = vector.load %arg8[%c0_15, %c0_16] : memref<1x128xf32, #tpu.memory_space<vmem>>, vector<1x128xf32>
    %21 = vector.broadcast %20 : vector<1x128xf32> to vector<16x128xf32>
    %22 = arith.addf %19, %21 : vector<16x128xf32>
    %cst_17 = arith.constant dense<0xFF800000> : vector<16xf32>
    %23 = vector.multi_reduction <maximumf>, %22, %cst_17 [1] : vector<16x128xf32> to vector<16xf32>
    %24 = vector.shape_cast %23 : vector<16xf32> to vector<16x1xf32>
    %25 = vector.broadcast %24 : vector<16x1xf32> to vector<16x128xf32>
    %26 = arith.subf %22, %25 : vector<16x128xf32>
    %27 = math.exp %26 : vector<16x128xf32>
    %cst_18 = arith.constant dense<0.000000e+00> : vector<16xf32>
    %28 = vector.multi_reduction <add>, %27, %cst_18 [1] : vector<16x128xf32> to vector<16xf32>
    %29 = vector.shape_cast %28 : vector<16xf32> to vector<16x1xf32>
    %30 = vector.broadcast %29 : vector<16x1xf32> to vector<16x128xf32>
    %31 = arith.divf %27, %30 : vector<16x128xf32>
    %c0_19 = arith.constant 0 : index
    %c0_20 = arith.constant 0 : index
    %32 = vector.load %arg9[%c0_19, %c0_20] : memref<1x128xf32, #tpu.memory_space<vmem>>, vector<1x128xf32>
    %33 = vector.broadcast %32 : vector<1x128xf32> to vector<16x128xf32>
    %34 = arith.mulf %19, %33 : vector<16x128xf32>
    %35 = arith.addf %31, %34 : vector<16x128xf32>
    %36 = arith.truncf %35 : vector<16x128xf32> to vector<16x128xbf16>
    %c0_21 = arith.constant 0 : index
    %c0_22 = arith.constant 0 : index
    %37 = vector.load %arg10[%c0_21, %c0_22] : memref<16x128xbf16, #tpu.memory_space<vmem>>, vector<16x128xbf16>
    tpu.vector_store %arg10[%c0_21, %c0_22], %36 {strides = array<i32>} : memref<16x128xbf16, #tpu.memory_space<vmem>>, vector<16x128xbf16>,
    return
  }
  func.func @transform_0(%arg0: i32) -> (i32, i32) {
    %c0_i32 = arith.constant 0 : i32
    %c0_i32_0 = arith.constant 0 : i32
    return %arg0, %c0_i32 : i32, i32
  }
  func.func @transform_1(%arg0: i32) -> (i32, i32) {
    %c0_i32 = arith.constant 0 : i32
    %c0_i32_0 = arith.constant 0 : i32
    %c0_i32_1 = arith.constant 0 : i32
    return %c0_i32, %c0_i32_0 : i32, i32
  }
  func.func @transform_2(%arg0: i32) -> (i32, i32) {
    %c0_i32 = arith.constant 0 : i32
    %c0_i32_0 = arith.constant 0 : i32
    %c0_i32_1 = arith.constant 0 : i32
    return %c0_i32, %c0_i32_0 : i32, i32
  }
  func.func @transform_3(%arg0: i32) -> (i32, i32) {
    %c0_i32 = arith.constant 0 : i32
    %c0_i32_0 = arith.constant 0 : i32
    %c0_i32_1 = arith.constant 0 : i32
    return %c0_i32, %c0_i32_0 : i32, i32
  }
  func.func @transform_4(%arg0: i32) -> (i32, i32) {
    %c0_i32 = arith.constant 0 : i32
    %c0_i32_0 = arith.constant 0 : i32
    %c0_i32_1 = arith.constant 0 : i32
    return %c0_i32, %c0_i32_0 : i32, i32
  }
  func.func @transform_5(%arg0: i32) -> (i32, i32) {
    %c0_i32 = arith.constant 0 : i32
    %c0_i32_0 = arith.constant 0 : i32
    %c0_i32_1 = arith.constant 0 : i32
    return %c0_i32, %c0_i32_0 : i32, i32
  }
  func.func @transform_6(%arg0: i32) -> (i32, i32) {
    %c0_i32 = arith.constant 0 : i32
    %c0_i32_0 = arith.constant 0 : i32
    %c0_i32_1 = arith.constant 0 : i32
    return %c0_i32, %c0_i32_0 : i32, i32
  }
  func.func @transform_7(%arg0: i32) -> (i32, i32) {
    %c0_i32 = arith.constant 0 : i32
    %c0_i32_0 = arith.constant 0 : i32
    %c0_i32_1 = arith.constant 0 : i32
    return %c0_i32, %c0_i32_0 : i32, i32
  }
  func.func @transform_8(%arg0: i32) -> (i32, i32) {
    %c0_i32 = arith.constant 0 : i32
    %c0_i32_0 = arith.constant 0 : i32
    %c0_i32_1 = arith.constant 0 : i32
    return %c0_i32, %c0_i32_0 : i32, i32
  }
  func.func @transform_9(%arg0: i32) -> (i32, i32) {
    %c0_i32 = arith.constant 0 : i32
    %c0_i32_0 = arith.constant 0 : i32
    return %arg0, %c0_i32 : i32, i32
  }
}

</mosaic_0001>

<bundles_post_ra>
// kernel: tpu_custom_call.1
= control target key start
LH: loop header
LB: loop body
LE: loop exit
PB: predicated region body
PF: predicated region fallthrough
CT: control target
= control target key end

     0   :  { %14 = vsyncpa [#allocation3], 0  ;;  %s907_s0 = inlined_call_operand.hbm [shape: bf16[16,32], index: 0, kind: input, shape index: {}]   ;;  %s908_s1 = inlined_call_operand.hbm [shape: bf16[32,128], index: 1, kind: input, shape index: {}]   ;;  %s909_s2 = inlined_call_operand.vmem [shape: f32[1,128], index: 2, kind: input, shape index: {}]   ;;  %s910_s3 = inlined_call_operand.hbm [shape: bf16[128,128], index: 3, kind: input, shape index: {}]   ;;  %s911_s4 = inlined_call_operand.vmem [shape: f32[1,128], index: 4, kind: input, shape index: {}]   ;;  %s912_s5 = inlined_call_operand.hbm [shape: bf16[128,128], index: 5, kind: input, shape index: {}]   ;;  %s913_s6 = inlined_call_operand.vmem [shape: f32[1,128], index: 6, kind: input, shape index: {}]   ;;  %s914_s7 = inlined_call_operand.vmem [shape: f32[1,128], index: 7, kind: input, shape index: {}]   ;;  %s915_s8 = inlined_call_operand.vmem [shape: f32[1,128], index: 8, kind: input, shape index: {}]   ;;  %s916_s9 = inlined_call_operand.hbm [shape: bf16[16,128], index: 9, kind: output, shape index: {}]  }
   0x1   :  { %15 = vsyncpa [#allocation6], 0 }
   0x2   :  { %16 = vsyncpa [#allocation9], 0 }
   0x3   :  { %17 = vsyncpa [#allocation4], 0  ;;  %s720_s30 = smov [#allocation5]   ;;  %s721_s11 = smov [#allocation2]  }
   0x4   :  { %s35_s10 = sshll.u32 %s720_s30, 4  ;;  %s23_s12 = sshll.u32 %s721_s11, 4  ;;  %s36_s10 = int_to_ptr.vmem [resolvable:$true] %s35_s10  ;;  %s779_s12 = int_to_ptr.vmem [resolvable:$true] %s23_s12 }
   0x5   :  { %s602_s15 = scalar_lea.hbm %s908_s1, 256 }
   0x6   :  { %p603_p0 = scmp.ne.s32.totalorder %s908_s1, %s602_s15  ;;  %p606_p1 = scmp.lt.u32.totalorder %s602_s15, %s908_s1 }
   0x8   :  { %p608_p2 = pnand %p606_p1, %p603_p0 }
   0xa   :  { %611 = shalt.err (!%p608_p2)
}
   0xb   :  { %s612_s20 = scalar_lea.vmem %s36_s10, 256  ;;  %p617_p4 = scmp.lt.s32.totalorder %s36_s10, %s36_s10 }
   0xc   :  { %p613_p3 = scmp.ne.s32.totalorder %s36_s10, %s612_s20  ;;  %p618_p5 = scmp.lt.s32.totalorder %s612_s20, %s612_s20 }
   0xe   :  { %p619_p6 = por %p618_p5, %p617_p4 }
  0x10   :  { %p620_p7 = pnand %p619_p6, %p613_p3 }
  0x12   :  { %623 = shalt.err (!%p620_p7)
}
  0x13   :  { %s722_s21 = smov 64   ;;  %s723_s22 = smov 4  }
  0x14   :  { %41 = dma.hbm_to_vmem [thread:$0]  %s908_s1, 256, %s36_s10, [#allocation6], %s722_s21, %s722_s21, %s723_s22  }
  0x15   :  { %s624_s27 = scalar_lea.hbm %s907_s0, 128 }
  0x16   :  { %p625_p8 = scmp.ne.s32.totalorder %s907_s0, %s624_s27  ;;  %p628_p9 = scmp.lt.u32.totalorder %s624_s27, %s907_s0 }
  0x18   :  { %p630_p10 = pnand %p628_p9, %p625_p8 }
  0x1a   :  { %633 = shalt.err (!%p630_p10)
}
  0x1b   :  { %s634_s13 = scalar_lea.vmem %s779_s12, 128  ;;  %p639_p12 = scmp.lt.s32.totalorder %s779_s12, %s779_s12 }
  0x1c   :  { %p635_p11 = scmp.ne.s32.totalorder %s779_s12, %s634_s13  ;;  %p640_p13 = scmp.lt.s32.totalorder %s634_s13, %s634_s13 }
  0x1e   :  { %p641_p0 = por %p640_p13, %p639_p12 }
  0x20   :  { %p642_p1 = pnand %p641_p0, %p635_p11 }
  0x22   :  { %645 = shalt.err (!%p642_p1)
}
  0x23   :  { %29 = dma.hbm_to_vmem [thread:$0]  %s907_s0, 128, %s779_s12, [#allocation3], %s722_s21, %s722_s21, %s723_s22  }
  0x24   :  { %s724_s14 = smov [#allocation7]   ;;  %s725_s16 = smov [#allocation8]  }
  0x25   :  { %s49_s15 = sshll.u32 %s724_s14, 4  ;;  %s63_s17 = sshll.u32 %s725_s16, 4  ;;  %s50_s15 = int_to_ptr.vmem [resolvable:$true] %s49_s15  ;;  %s816_s17 = int_to_ptr.vmem [resolvable:$true] %s63_s17 }
  0x26   :  { %s646_s20 = scalar_lea.hbm %s910_s3, 1024 }
  0x27   :  { %p647_p2 = scmp.ne.s32.totalorder %s910_s3, %s646_s20  ;;  %p650_p3 = scmp.lt.u32.totalorder %s646_s20, %s910_s3 }
  0x29   :  { %p652_p4 = pnand %p650_p3, %p647_p2 }
  0x2b   :  { %655 = shalt.err (!%p652_p4)
}
  0x2c   :  { %s656_s0 = scalar_lea.vmem %s50_s15, 1024  ;;  %p661_p6 = scmp.lt.s32.totalorder %s50_s15, %s50_s15 }
  0x2d   :  { %p657_p5 = scmp.ne.s32.totalorder %s50_s15, %s656_s0  ;;  %p662_p7 = scmp.lt.s32.totalorder %s656_s0, %s656_s0 }
  0x2f   :  { %p663_p8 = por %p662_p7, %p661_p6 }
  0x31   :  { %p664_p9 = pnand %p663_p8, %p657_p5 }
  0x33   :  { %667 = shalt.err (!%p664_p9)
}
  0x34   :  { %55 = dma.hbm_to_vmem [thread:$0]  %s910_s3, 1024, %s50_s15, [#allocation6], %s722_s21, %s722_s21, %s723_s22  }
  0x35   :  { %s668_s30 = scalar_lea.hbm %s912_s5, 1024 }
  0x36   :  { %p669_p10 = scmp.ne.s32.totalorder %s912_s5, %s668_s30  ;;  %p672_p11 = scmp.lt.u32.totalorder %s668_s30, %s912_s5 }
  0x38   :  { %p674_p12 = pnand %p672_p11, %p669_p10 }
  0x3a   :  { %677 = shalt.err (!%p674_p12)
}
  0x3b   :  { %s678_s14 = scalar_lea.vmem %s816_s17, 1024  ;;  %p683_p0 = scmp.lt.s32.totalorder %s816_s17, %s816_s17 }
  0x3c   :  { %p679_p13 = scmp.ne.s32.totalorder %s816_s17, %s678_s14  ;;  %p684_p1 = scmp.lt.s32.totalorder %s678_s14, %s678_s14 }
  0x3e   :  { %p685_p2 = por %p684_p1, %p683_p0 }
  0x40   :  { %p686_p3 = pnand %p685_p2, %p679_p13 }
  0x42   :  { %689 = shalt.err (!%p686_p3)
}
  0x43   :  { %69 = dma.hbm_to_vmem [thread:$0]  %s912_s5, 1024, %s816_s17, [#allocation9], %s722_s21, %s722_s21, %s723_s22  }
  0x44   :  { %712 = dma.done.wait [#allocation3], 128  }
  0x45   :  { %713 = vsyncadd [#allocation3], 4294967168 }
  0x46   :  { %714 = dma.done.wait [#allocation6], 1280  }
  0x47   :  { %715 = vsyncadd [#allocation6], 4294966016 }
  0x48   :  { %716 = dma.done.wait [#allocation9], 1024  }
  0x49   :  { %717 = vsyncadd [#allocation9], 4294966272  ;;  %v726_v0 = vmov 0.0   ;;  %vm727_vm0 = vmmov 0   ;;  %v571_v1 = vld [vmem:[#allocation5] sm:$0xff]   ;;  %v572_v2 = vld [vmem:[#allocation5 + $0x8] sm:$0xff]  }
  0x4a   :  { %514 = vmatprep.subr.bf16.mxu0 %v726_v0  ;;  %518 = vmatprep.mubr.msk.bf16.mxu0 %vm727_vm0, %v726_v0  ;;  %v574_v3 = vld [vmem:[#allocation7] sm:$0xff]   ;;  %v573_v4 = vld [vmem:[#allocation2] sm:$0xff]   ;;  %vm119_vm1 = vcmask 261120   ;;  %v576_v6 = vld [vmem:[#allocation7 + $0x10] sm:$0xff]  }
  0x4b   :  { %522 = vmatprep.subr.bf16.mxu1 %v726_v0  ;;  %538 = vmatprep.mubr.msk.bf16.mxu1 %vm727_vm0, %v726_v0  ;;  %v575_v5 = vld [vmem:[#allocation7 + $0x8] sm:$0xff]   ;;  %v577_v7 = vld [vmem:[#allocation7 + $0x18] sm:$0xff]   ;;  %v578_v8 = vld [vmem:[#allocation7 + $0x20] sm:$0xff]  }
  0x4c   :  { %515 = vmatpush3.bf16.msra.mxu0 %v571_v1  ;;  %523 = vmatpush3.bf16.msra.mxu1 %v574_v3  ;;  %v579_v9 = vld [vmem:[#allocation7 + $0x28] sm:$0xff]   ;;  %v580_v10 = vld [vmem:[#allocation7 + $0x30] sm:$0xff]   ;;  %v581_v11 = vld [vmem:[#allocation7 + $0x38] sm:$0xff]  }
  0x4d   :  { %516 = vmatprep.subr.bf16.mxu0 %v726_v0  ;;  %524 = vmatprep.subr.bf16.mxu1 %v726_v0  ;;  %v582_v12 = vld [vmem:[#allocation8] sm:$0xff]   ;;  %v583_v13 = vld [vmem:[#allocation8 + $0x8] sm:$0xff]   ;;  %v584_v14 = vld [vmem:[#allocation8 + $0x10] sm:$0xff]  }
  0x4e   :  { %v459_v15 = vld [vmem:[%s909_s2] ss:$0 sm:$0xff]  ;;  %v585_v24 = vld [vmem:[#allocation8 + $0x18] sm:$0xff]   ;;  %v586_v25 = vld [vmem:[#allocation8 + $0x20] sm:$0xff]  }
  0x4f   :  { %v587_v26 = vld [vmem:[#allocation8 + $0x28] sm:$0xff]   ;;  %v588_v27 = vld [vmem:[#allocation8 + $0x30] sm:$0xff]   ;;  %v589_v28 = vld [vmem:[#allocation8 + $0x38] sm:$0xff]  }
  0x50   :  { %517 = vmatpush3.bf16.msra.mxu0 %v572_v2  ;;  %525 = vmatpush3.bf16.msra.mxu1 %v575_v5  ;;  %v464_v29 = vld [vmem:[%s911_s4] ss:$0 sm:$0xff] }
  0x51   :  { %542 = vmatprep.subr.bf16.mxu0 %v726_v0  ;;  %526 = vmatprep.subr.bf16.mxu1 %v726_v0  ;;  %v473_v38 = vld [vmem:[%s913_s6] ss:$0 sm:$0xff] }
  0x52   :  { %v482_v40 = vld [vmem:[%s914_s7] ss:$0 sm:$0xff]  ;;  %s728_s7 = smov [#allocation10]  }
  0x53   :  { %519 = vmatmul.mubr.msk.bf16.vlgmr.msra.gmra.mrb[0].mxu0 %vm119_vm1, %v573_v4  ;;  %v483_v59 = vld [vmem:[%s915_s8] ss:$0 sm:$0xff]  ;;  %s445_s24 = sshll.u32 %s728_s7, 4  ;;  %s446_s24 = int_to_ptr.vmem [resolvable:$true] %s445_s24 }
  0x54   :  { %558 = vmatprep.mubr.msk.bf16.mxu0 %vm727_vm0, %v726_v0  ;;  %527 = vmatpush3.bf16.msra.mxu1 %v576_v6  ;;  %s690_s25 = scalar_lea.vmem %s446_s24, 128  ;;  %p695_p5 = scmp.lt.s32.totalorder %s446_s24, %s446_s24 }
  0x55   :  { %528 = vmatprep.subr.bf16.mxu1 %v726_v0  ;;  %543 = vmatpush3.bf16.msra.mxu0 %v582_v12  ;;  %p691_p4 = scmp.ne.s32.totalorder %s446_s24, %s690_s25  ;;  %p696_p6 = scmp.lt.s32.totalorder %s690_s25, %s690_s25 }
  0x56   :  { %544 = vmatprep.subr.bf16.mxu0 %v726_v0 }
  0x57   :  { %p697_p7 = por %p696_p6, %p695_p5 }
  0x58   :  { %529 = vmatpush3.bf16.msra.mxu1 %v577_v7 }
  0x59   :  { %530 = vmatprep.subr.bf16.mxu1 %v726_v0  ;;  %545 = vmatpush3.bf16.msra.mxu0 %v583_v13  ;;  %p698_p8 = pnand %p697_p7, %p691_p4 }
  0x5a   :  { %546 = vmatprep.subr.bf16.mxu0 %v726_v0 }
  0x5c   :  { %531 = vmatpush3.bf16.msra.mxu1 %v578_v8 }
  0x5d   :  { %532 = vmatprep.subr.bf16.mxu1 %v726_v0  ;;  %547 = vmatpush3.bf16.msra.mxu0 %v584_v14 }
  0x5e   :  { %548 = vmatprep.subr.bf16.mxu0 %v726_v0 }
  0x60   :  { %533 = vmatpush3.bf16.msra.mxu1 %v579_v9 }
  0x61   :  { %534 = vmatprep.subr.bf16.mxu1 %v726_v0  ;;  %549 = vmatpush3.bf16.msra.mxu0 %v585_v24 }
  0x62   :  { %550 = vmatprep.subr.bf16.mxu0 %v726_v0 }
  0x64   :  { %535 = vmatpush3.bf16.msra.mxu1 %v580_v10 }
  0x65   :  { %536 = vmatprep.subr.bf16.mxu1 %v726_v0  ;;  %551 = vmatpush3.bf16.msra.mxu0 %v586_v25 }
  0x66   :  { %552 = vmatprep.subr.bf16.mxu0 %v726_v0 }
  0x68   :  { %537 = vmatpush3.bf16.msra.mxu1 %v581_v11 }
  0x69   :  { %553 = vmatpush3.bf16.msra.mxu0 %v587_v26 }
  0x6a   :  { %554 = vmatprep.subr.bf16.mxu0 %v726_v0 }
  0x6d   :  { %555 = vmatpush3.bf16.msra.mxu0 %v588_v27 }
  0x6e   :  { %556 = vmatprep.subr.bf16.mxu0 %v726_v0 }
  0x71   :  { %557 = vmatpush3.bf16.msra.mxu0 %v589_v28 }
 0x126   :  { %v157_v16 = vpop.f32.mrb[0].mxu0 }
 0x127   :  { %v520_v17 = vpop.f32.mrb[1].mxu0  ;;  %v158_v19 = vadd.f32 %v459_v15, %v157_v16 }
 0x128   :  { %v160_v18 = vpop.f32.mrb[2].mxu0 }
 0x129   :  { %v161_v20 = vadd.f32 %v459_v15, %v160_v18  ;;  %v521_v21 = vpop.f32.mrb[3].mxu0 }
 0x12b   :  { %v164_v22 = vpack.c.bf16 %v161_v20, %v158_v19 }
 0x12d   :  { %590 = vtanh.bf16 %v164_v22 }
 0x138   :  { %v591_v23 = vpop.eup %590 }
 0x139   :  { %539 = vmatmul.mubr.bf16.vlgmr.msra.gmra.mrb[0].mxu1 %v591_v23 }
 0x20c   :  { %v271_v30 = vpop.f32.mrb[0].mxu1 }
 0x20d   :  { %v540_v31 = vpop.f32.mrb[1].mxu1  ;;  %v272_v33 = vadd.f32 %v464_v29, %v271_v30 }
 0x20e   :  { %v274_v32 = vpop.f32.mrb[2].mxu1 }
 0x20f   :  { %v275_v34 = vadd.f32 %v464_v29, %v274_v32  ;;  %v541_v35 = vpop.f32.mrb[3].mxu1 }
 0x211   :  { %v278_v36 = vpack.c.bf16 %v275_v34, %v272_v33 }
 0x213   :  { %592 = vtanh.bf16 %v278_v36 }
 0x21e   :  { %v593_v37 = vpop.eup %592 }
 0x21f   :  { %559 = vmatmul.mubr.bf16.vlgmr.msra.gmra.mrb[4].mxu0 %v593_v37 }
 0x2f2   :  { %v385_v39 = vpop.f32.mrb[4].mxu0 }
 0x2f3   :  { %v386_v41 = vadd.f32 %v473_v38, %v385_v39  ;;  %v560_v42 = vpop.f32.mrb[5].mxu0 }
 0x2f4   :  { %v388_v43 = vpop.f32.mrb[6].mxu0 }
 0x2f5   :  { %v389_v44 = vadd.f32 %v473_v38, %v388_v43  ;;  %v561_v45 = vpop.f32.mrb[7].mxu0  ;;  %v399_v46 = vadd.f32 %v482_v40, %v386_v41  ;;  %v426_v62 = vmul.f32 %v483_v59, %v386_v41 }
 0x2f7   :  { %401 = vmax.xlane.f32.xlu0 %v399_v46  ;;  %v400_v47 = vadd.f32 %v482_v40, %v389_v44  ;;  %v427_v63 = vmul.f32 %v483_v59, %v389_v44 }
 0x2fb   :  { %403 = vmax.xlane.f32.xlu0 %v400_v47 }
 0x384   :  { %v402_v48 = vpop.xlane.xlu0 %401 }
 0x385   :  { %v405_v49 = vsub.f32 %v399_v46, %v402_v48 }
 0x387   :  { %v407_v50 = vmul.f32 1.442695, %v405_v49 }
 0x388   :  { %v404_v51 = vpop.xlane.xlu0 %403 }
 0x389   :  { %594 = vpow2.f32 %v407_v50  ;;  %v406_v52 = vsub.f32 %v400_v47, %v404_v51 }
 0x38b   :  { %v409_v53 = vmul.f32 1.442695, %v406_v52 }
 0x38d   :  { %596 = vpow2.f32 %v409_v53 }
 0x393   :  { %v595_v54 = vpop.eup %594 }
 0x394   :  { %411 = vadd.xlane.f32.xlu1 %v595_v54 }
 0x397   :  { %v597_v55 = vpop.eup %596 }
 0x398   :  { %413 = vadd.xlane.f32.xlu1 %v597_v55 }
 0x421   :  { %v412_v56 = vpop.xlane.xlu1 %411 }
 0x422   :  { %598 = vrcp.f32 %v412_v56 }
 0x425   :  { %v414_v57 = vpop.xlane.xlu1 %413 }
 0x426   :  { %600 = vrcp.f32 %v414_v57 }
 0x42c   :  { %v599_v58 = vpop.eup %598 }
 0x42d   :  { %v416_v60 = vmul.f32 %v599_v58, %v595_v54 }
 0x42f   :  { %v428_v1 = vadd.f32 %v426_v62, %v416_v60 }
 0x430   :  { %v601_v61 = vpop.eup %600 }
 0x431   :  { %v418_v0 = vmul.f32 %v601_v61, %v597_v55 }
 0x433   :  { %v429_v2 = vadd.f32 %v427_v63, %v418_v0 }
 0x435   :  { %v491_v3 = vpack.c.bf16 %v429_v2, %v428_v1 }
 0x437   :  { %492 = vst [vmem:[#allocation10] sm:$0xff] %v491_v3  }
 0x438   :  { %701 = shalt.err (!%p698_p8)
}
 0x439   :  { %s702_s0 = scalar_lea.hbm %s916_s9, 128 }
 0x43a   :  { %p703_p9 = scmp.ne.s32.totalorder %s916_s9, %s702_s0  ;;  %p706_p10 = scmp.lt.u32.totalorder %s702_s0, %s916_s9 }
 0x43c   :  { %p708_p11 = pnand %p706_p10, %p703_p9 }
 0x43e   :  { %711 = shalt.err (!%p708_p11)
}
 0x43f   :  { %451 = dma.vmem_to_hbm [thread:$0]  %s446_s24, 128, %s916_s9, [#allocation4], %s722_s21, %s722_s21, %s723_s22  }
 0x440   :  { %718 = dma.done.wait [#allocation4], 128  }
 0x441   :  { %719 = vsyncadd [#allocation4], 4294967168 }
 0x442   :  { %455 = vsyncpa [#allocation3], 1 }
 0x443   :  { %456 = vsyncpa [#allocation6], 1 }
 0x444   :  { %457 = vsyncpa [#allocation9], 1 }
 0x445   :  { %458 = vsyncpa [#allocation4], 1 }

</bundles_post_ra>
